<compile_context>
chip_gen: v7x
topology: tpu7x:2x2x1
jax: 0.10.0
libtpu: 0.0.40
codegen_flags: <defaults>
</compile_context>

<pallas_src>
import functools

import jax
import jax.numpy as jnp
from jax.experimental import pallas as pl
from jax.experimental.pallas import tpu as pltpu

QMIN = -128.0
QMAX = 127.0


def _fake_quant(v, scale, zp):
    q = jnp.clip(jnp.round(v / scale + zp), QMIN, QMAX)
    return (q - zp) * scale


def _qlinear_act_kernel(act_params_ref, x_ref, w_ref, b_ref, o_ref, acc_ref):
    """One (tm, tn) output tile, accumulated over the K grid axis (last, arbitrary).

    act_params_ref (SMEM, f32[3]) = [1/scale_a, scale_a, zp_a]
    x_ref   : (tm, tk)  compute dtype
    w_ref   : (tk, tn)  compute dtype, already fake-quantized + transposed
    b_ref   : (1, tn)   f32
    o_ref   : (tm, tn)  output dtype
    acc_ref : (tm, tn)  f32 VMEM scratch
    """
    k = pl.program_id(2)

    @pl.when(k == 0)
    def _():
        acc_ref[...] = jnp.zeros_like(acc_ref)

    # MXU matmul (bf16 operands by default), f32 accumulation. No per-step VPU
    # work on the weight and no transpose: both were hoisted to the wrapper.
    acc_ref[...] += jnp.dot(x_ref[...], w_ref[...],
                            preferred_element_type=jnp.float32)

    @pl.when(k == pl.num_programs(2) - 1)
    def _():
        inv_scale_a = act_params_ref[0]
        scale_a = act_params_ref[1]
        zp_a = act_params_ref[2]          # zp == 0 for symmetric int8; kept for generality
        y = acc_ref[...] + b_ref[...]                        # (tm, tn) + (1, tn)
        q = jnp.clip(jnp.round(y * inv_scale_a + zp_a), QMIN, QMAX)
        o_ref[...] = ((q - zp_a) * scale_a).astype(o_ref.dtype)


def _round_up(a, b):
    return ((a + b - 1) // b) * b


def _pick_tile(dim, preferred, align):
    """Largest multiple of `align` <= preferred that divides dim; else the full dim."""
    if dim % align == 0:
        t = (min(preferred, dim) // align) * align
        while t >= align:
            if dim % t == 0:
                return t
            t -= align
    return dim


@functools.partial(jax.jit, static_argnames=("tm", "tn", "tk", "compute_dtype"))
def qlinear_act(x, weight, bias, quant_params, *, tm=256, tn=256, tk=512,
                compute_dtype=jnp.bfloat16):
    """x: (..., K); weight: (N, K) as stored by nn.Linear; bias: (N,);
    quant_params: (4,) f32 = [scale_w, zp_w, scale_a, zp_a]."""
    assert tm >= 8 and tm % 8 == 0

    orig_shape = x.shape
    n_out, k_in = weight.shape
    x2d = x.reshape(-1, k_in)
    m = x2d.shape[0]

    scale_w = quant_params[0]
    zp_w = quant_params[1]
    scale_a = quant_params[2]
    zp_a = quant_params[3]

    # Hoisted, one-shot weight fake-quant + transpose to (K, N) lane-dense.
    w_q_t = _fake_quant(weight, scale_w, zp_w).T.astype(compute_dtype)
    x2d_c = x2d.astype(compute_dtype)
    bias2d = bias.reshape(1, n_out).astype(jnp.float32)
    act_params = jnp.stack([1.0 / scale_a, scale_a, zp_a]).astype(jnp.float32)

    # Tile selection (respect the (8,128) layout rule; fall back to full dims
    # for small layers such as the unit test below).
    tm_eff = min(tm, _round_up(m, 8))
    tn_eff = _pick_tile(n_out, tn, 128)
    tk_eff = _pick_tile(k_in, tk, 128)

    m_pad = _round_up(m, tm_eff)
    if m_pad != m:
        x2d_c = jnp.pad(x2d_c, ((0, m_pad - m), (0, 0)))

    grid = (m_pad // tm_eff, n_out // tn_eff, k_in // tk_eff)

    out = pl.pallas_call(
        _qlinear_act_kernel,
        out_shape=jax.ShapeDtypeStruct((m_pad, n_out), x.dtype),
        grid_spec=pltpu.PrefetchScalarGridSpec(
            num_scalar_prefetch=0,
            grid=grid,
            in_specs=[
                # quant scalars resident in SMEM for the whole kernel
                pl.BlockSpec(memory_space=pltpu.MemorySpace.SMEM),
                pl.BlockSpec((tm_eff, tk_eff), lambda i, j, k: (i, k)),   # x tile
                pl.BlockSpec((tk_eff, tn_eff), lambda i, j, k: (k, j)),   # w_q^T tile
                pl.BlockSpec((1, tn_eff), lambda i, j, k: (0, j)),        # bias tile
            ],
            out_specs=pl.BlockSpec((tm_eff, tn_eff), lambda i, j, k: (i, j)),
            scratch_shapes=[pltpu.VMEM((tm_eff, tn_eff), jnp.float32)],
        ),
        compiler_params=pltpu.CompilerParams(
            dimension_semantics=("parallel", "parallel", "arbitrary"),
            vmem_limit_bytes=32 * 1024 * 1024,   # explicit; tiles use ~2 MiB, safe on v5e/v6e/v7x
        ),
    )(act_params, x2d_c, w_q_t, bias2d)

    out = out[:m]
    return out.reshape(*orig_shape[:-1], n_out)


def _symmetric_int8_params(v):
    """MinmaxObserver (signed -> symmetric): scale = max|v| / ((qmax - qmin)/2), zp = 0."""
    max_abs = jnp.maximum(jnp.max(v), -jnp.min(v))
    scale = jnp.maximum(max_abs / ((QMAX - QMIN) / 2.0), 1e-8)
    zp = jnp.float32(0.0)
    return scale, zp


if __name__ == "__main__":
    # Small shapes consistent with a transformer linear: (batch=2, seq=8, hidden=32)
    batch, seq, in_features, out_features = 2, 8, 32, 32

    key = jax.random.PRNGKey(0)
    kx, kw, kb = jax.random.split(key, 3)
    x = jax.random.normal(kx, (batch, seq, in_features), dtype=jnp.float32)
    weight = jax.random.normal(kw, (out_features, in_features), dtype=jnp.float32) * 0.1
    bias = jax.random.normal(kb, (out_features,), dtype=jnp.float32) * 0.01

    # ---- Calibration (plain JAX glue; mimics observer_w / observer_a minmax) ----
    scale_w, zp_w = _symmetric_int8_params(weight)
    w_q_ref = _fake_quant(weight, scale_w, zp_w)
    y_calib = jnp.dot(x.reshape(-1, in_features), w_q_ref.T,
                      precision=jax.lax.Precision.HIGHEST) + bias
    scale_a, zp_a = _symmetric_int8_params(y_calib)
    params = jnp.stack([scale_w, zp_w, scale_a, zp_a]).astype(jnp.float32)

    # ---- Run the Pallas kernel ----
    out = qlinear_act(x, weight, bias, params)
    out = jax.block_until_ready(out)

    # ---- Pure-JAX reference of the quant=True forward path (f32, highest precision) ----
    out_ref = _fake_quant(y_calib, scale_a, zp_a).reshape(batch, seq, out_features)

    assert out.shape == (batch, seq, out_features)

    # 1) Every output must sit on the int8 activation quant grid.
    q_lvl = out / scale_a + zp_a
    assert float(jnp.max(jnp.abs(q_lvl - jnp.round(q_lvl)))) < 1e-2, "output not on quant grid"
    assert float(jnp.min(q_lvl)) >= QMIN - 1e-2 and float(jnp.max(q_lvl)) <= QMAX + 1e-2

    # 2) Match the reference to within at most ONE quantization step per element.
    #    The minmax observer places max|y| exactly on a x.5 rounding boundary and the
    #    kernel feeds the MXU bf16 operands, so isolated one-bin flips are expected;
    #    anything larger (or many flips) would be a real bug.
    diff = jnp.abs(out - out_ref)
    scale_a_f = float(scale_a)
    assert float(jnp.max(diff)) <= 1.01 * scale_a_f, "mismatch vs reference (> 1 quant step)"
    assert float(jnp.mean(diff)) <= 0.5 * scale_a_f, "too many quant-bin flips vs reference"

    print("KERNEL_OK")
</pallas_src>

<mosaic_0001>
module attributes {stable_mosaic.version = 11 : i64} {
  func.func @_qlinear_act_kernel(%arg0: i32, %arg1: i32, %arg2: i32, %arg3: memref<3xf32, #tpu.memory_space<smem>>, %arg4: memref<16x32xbf16, #tpu.memory_space<vmem>>, %arg5: memref<32x32xbf16, #tpu.memory_space<vmem>>, %arg6: memref<1x32xf32, #tpu.memory_space<vmem>>, %arg7: memref<16x32xf32, #tpu.memory_space<vmem>>, %arg8: memref<16x32xf32, #tpu.memory_space<vmem>>) attributes {dimension_semantics = [#tpu.dimension_semantics<parallel>, #tpu.dimension_semantics<parallel>, #tpu.dimension_semantics<arbitrary>], iteration_bounds = array<i64: 1, 1, 1>, scalar_prefetch = 0 : i64, scratch_operands = 1 : i64, tpu.core_type = #tpu.core_type<tc>, window_params = [{transform_indices = @transform_0, window_bounds = array<i64: 3>}, {transform_indices = @transform_1, window_bounds = array<i64: 16, 32>}, {transform_indices = @transform_2, window_bounds = array<i64: 32, 32>}, {transform_indices = @transform_3, window_bounds = array<i64: 1, 32>}, {transform_indices = @transform_4, window_bounds = array<i64: 16, 32>}]} {
    %c0_i32 = arith.constant 0 : i32
    %0 = arith.cmpi eq, %arg2, %c0_i32 : i32
    %1 = arith.extui %0 : i1 to i32
    %c0_i32_0 = arith.constant 0 : i32
    %2 = arith.cmpi ne, %1, %c0_i32_0 : i32
    scf.if %2 {
      %cst_10 = arith.constant 0.000000e+00 : f32
      %12 = vector.broadcast %cst_10 : f32 to vector<16x32xf32>
      %c0_11 = arith.constant 0 : index
      %c0_12 = arith.constant 0 : index
      %13 = vector.load %arg8[%c0_11, %c0_12] : memref<16x32xf32, #tpu.memory_space<vmem>>, vector<16x32xf32>
      tpu.vector_store %arg8[%c0_11, %c0_12], %12 {strides = array<i32>} : memref<16x32xf32, #tpu.memory_space<vmem>>, vector<16x32xf32>,
    } else {
    }
    %c0 = arith.constant 0 : index
    %c0_1 = arith.constant 0 : index
    %3 = vector.load %arg8[%c0, %c0_1] : memref<16x32xf32, #tpu.memory_space<vmem>>, vector<16x32xf32>
    %c0_2 = arith.constant 0 : index
    %c0_3 = arith.constant 0 : index
    %4 = vector.load %arg4[%c0_2, %c0_3] : memref<16x32xbf16, #tpu.memory_space<vmem>>, vector<16x32xbf16>
    %c0_4 = arith.constant 0 : index
    %c0_5 = arith.constant 0 : index
    %5 = vector.load %arg5[%c0_4, %c0_5] : memref<32x32xbf16, #tpu.memory_space<vmem>>, vector<32x32xbf16>
    %cst = arith.constant dense<0.000000e+00> : vector<16x32xf32>
    %6 = tpu.matmul %4, %5, %cst {dimension_numbers = #tpu.dot_dimension_numbers<[1], [0], [0], [1], [0, 0, 1, 1], [], []>} : vector<16x32xbf16>, vector<32x32xbf16>, vector<16x32xf32> -> vector<16x32xf32>
    %7 = arith.addf %3, %6 : vector<16x32xf32>
    %c0_6 = arith.constant 0 : index
    %c0_7 = arith.constant 0 : index
    %8 = vector.load %arg8[%c0_6, %c0_7] : memref<16x32xf32, #tpu.memory_space<vmem>>, vector<16x32xf32>
    tpu.vector_store %arg8[%c0_6, %c0_7], %7 {strides = array<i32>} : memref<16x32xf32, #tpu.memory_space<vmem>>, vector<16x32xf32>,
    %c0_i32_8 = arith.constant 0 : i32
    %9 = arith.cmpi eq, %arg2, %c0_i32_8 : i32
    %10 = arith.extui %9 : i1 to i32
    %c0_i32_9 = arith.constant 0 : i32
    %11 = arith.cmpi ne, %10, %c0_i32_9 : i32
    scf.if %11 {
      %c0_10 = arith.constant 0 : index
      %12 = memref.load %arg3[%c0_10] : memref<3xf32, #tpu.memory_space<smem>>
      %c1 = arith.constant 1 : index
      %13 = memref.load %arg3[%c1] : memref<3xf32, #tpu.memory_space<smem>>
      %c2 = arith.constant 2 : index
      %14 = memref.load %arg3[%c2] : memref<3xf32, #tpu.memory_space<smem>>
      %c0_11 = arith.constant 0 : index
      %c0_12 = arith.constant 0 : index
      %15 = vector.load %arg8[%c0_11, %c0_12] : memref<16x32xf32, #tpu.memory_space<vmem>>, vector<16x32xf32>
      %c0_13 = arith.constant 0 : index
      %c0_14 = arith.constant 0 : index
      %16 = vector.load %arg6[%c0_13, %c0_14] : memref<1x32xf32, #tpu.memory_space<vmem>>, vector<1x32xf32>
      %17 = vector.broadcast %16 : vector<1x32xf32> to vector<16x32xf32>
      %18 = arith.addf %15, %17 : vector<16x32xf32>
      %19 = vector.broadcast %12 : f32 to vector<16x32xf32>
      %20 = arith.mulf %18, %19 : vector<16x32xf32>
      %21 = vector.broadcast %14 : f32 to vector<16x32xf32>
      %22 = arith.addf %20, %21 : vector<16x32xf32>
      %23 = math.roundeven %22 : vector<16x32xf32>
      %cst_15 = arith.constant -1.280000e+02 : f32
      %cst_16 = arith.constant 1.270000e+02 : f32
      %24 = vector.broadcast %cst_15 : f32 to vector<16x32xf32>
      %25 = arith.maximumf %24, %23 : vector<16x32xf32>
      %26 = vector.broadcast %cst_16 : f32 to vector<16x32xf32>
      %27 = arith.minimumf %26, %25 : vector<16x32xf32>
      %28 = vector.broadcast %14 : f32 to vector<16x32xf32>
      %29 = arith.subf %27, %28 : vector<16x32xf32>
      %30 = vector.broadcast %13 : f32 to vector<16x32xf32>
      %31 = arith.mulf %29, %30 : vector<16x32xf32>
      %c0_17 = arith.constant 0 : index
      %c0_18 = arith.constant 0 : index
      %32 = vector.load %arg7[%c0_17, %c0_18] : memref<16x32xf32, #tpu.memory_space<vmem>>, vector<16x32xf32>
      tpu.vector_store %arg7[%c0_17, %c0_18], %31 {strides = array<i32>} : memref<16x32xf32, #tpu.memory_space<vmem>>, vector<16x32xf32>,
    } else {
    }
    return
  }
  func.func @transform_0(%arg0: i32, %arg1: i32, %arg2: i32) -> i32 {
    %c0_i32 = arith.constant 0 : i32
    %c0_i32_0 = arith.constant 0 : i32
    return %c0_i32 : i32
  }
  func.func @transform_1(%arg0: i32, %arg1: i32, %arg2: i32) -> (i32, i32) {
    %c0_i32 = arith.constant 0 : i32
    return %arg0, %arg2 : i32, i32
  }
  func.func @transform_2(%arg0: i32, %arg1: i32, %arg2: i32) -> (i32, i32) {
    %c0_i32 = arith.constant 0 : i32
    return %arg2, %arg1 : i32, i32
  }
  func.func @transform_3(%arg0: i32, %arg1: i32, %arg2: i32) -> (i32, i32) {
    %c0_i32 = arith.constant 0 : i32
    %c0_i32_0 = arith.constant 0 : i32
    return %c0_i32, %arg1 : i32, i32
  }
  func.func @transform_4(%arg0: i32, %arg1: i32, %arg2: i32) -> (i32, i32) {
    %c0_i32 = arith.constant 0 : i32
    return %arg0, %arg1 : i32, i32
  }
}

</mosaic_0001>

<bundles_post_ra>
// kernel: qlinear_act.1
= control target key start
LH: loop header
LB: loop body
LE: loop exit
PB: predicated region body
PF: predicated region fallthrough
CT: control target
= control target key end

     0   :  { %9 = vsyncpa [#allocation5], 0  ;;  %s298_s0 = inlined_call_operand.vmem [shape: f32[3], index: 0, kind: input, shape index: {}]   ;;  %s299_s1 = inlined_call_operand.vmem [shape: bf16[16,32], index: 1, kind: input, shape index: {}]   ;;  %s300_s2 = inlined_call_operand.vmem [shape: bf16[32,32], index: 2, kind: input, shape index: {}]   ;;  %s301_s3 = inlined_call_operand.vmem [shape: f32[1,32], index: 3, kind: input, shape index: {}]   ;;  %s302_s4 = inlined_call_operand.hbm [shape: f32[16,32], index: 4, kind: output, shape index: {}]  }
   0x1   :  { %10 = vsyncpa [#allocation4], 0  ;;  %s17_s17 = sshll.u32 %s298_s0, 4  ;;  %s18_s17 = int_to_ptr.vmem [resolvable:$true] %s17_s17 }
   0x2   :  { %s195_s18 = scalar_lea.vmem %s18_s17, 16  ;;  %p200_p1 = scmp.lt.s32.totalorder %s18_s17, %s18_s17 }
   0x3   :  { %p196_p0 = scmp.ne.s32.totalorder %s18_s17, %s195_s18  ;;  %p201_p2 = scmp.lt.s32.totalorder %s195_s18, %s195_s18 }
   0x5   :  { %p202_p3 = por %p201_p2, %p200_p1 }
   0x7   :  { %p203_p4 = pnand %p202_p3, %p196_p0 }
   0x9   :  { %206 = shalt.err (!%p203_p4)
}
   0xa   :  { %s233_s19 = smov [#allocation3]  }
   0xb   :  { %20 = dma.vmem_to_smem %s18_s17, 16, %s233_s19, [#allocation5]  }
   0xc   :  { %229 = dma.done.wait [#allocation5], 16  }
   0xd   :  { %230 = vsyncadd [#allocation5], 4294967280 }
   0xe   :  { %30 = sfence }
   0xf   :  { %v192_v0 = vld [vmem:[%s300_s2] sm:$0xff]   ;;  %v234_v1 = vmov 0.0   ;;  %v193_v2 = vld [vmem:[%s300_s2 + $0x8] sm:$0xff]   ;;  %vm235_vm0 = vmmov 0   ;;  %vm36_vm1 = vcmask 261120   ;;  %s116_s2 = sld [smem:[#allocation3]] }
  0x10   :  { %176 = vmatprep.subr.bf16.mxu0 %v234_v1  ;;  %180 = vmatprep.mubr.msk.bf16.mxu0 %vm235_vm0, %v234_v1  ;;  %37 = vst.msk [vmem:[#allocation2] sm:$0xff] %vm36_vm1, %v234_v1  ;;  %38 = vst.msk [vmem:[#allocation2 + $0x8] sm:$0xff] %vm36_vm1, %v234_v1  ;;  %v194_v3 = vld [vmem:[%s299_s1] sm:$0xff]   ;;  %s171_s25 = sld [smem:[#allocation3 + $0x2]]  ;;  %s170_s1 = sld [smem:[#allocation3 + $0x1]] }
  0x11   :  { %177 = vmatpush3.bf16.msra.mxu0 %v192_v0  ;;  %v172_v12 = vld [vmem:[%s301_s3] ss:$0 sm:$0xff]  ;;  %s236_s3 = smov [#allocation6]  }
  0x12   :  { %178 = vmatprep.subr.bf16.mxu0 %v234_v1  ;;  %s154_s28 = sshll.u32 %s236_s3, 4  ;;  %s155_s28 = int_to_ptr.vmem [resolvable:$true] %s154_s28 }
  0x13   :  { %s207_s29 = scalar_lea.vmem %s155_s28, 256  ;;  %p212_p6 = scmp.lt.s32.totalorder %s155_s28, %s155_s28 }
  0x14   :  { %p208_p5 = scmp.ne.s32.totalorder %s155_s28, %s207_s29  ;;  %p213_p7 = scmp.lt.s32.totalorder %s207_s29, %s207_s29 }
  0x15   :  { %179 = vmatpush3.bf16.msra.mxu0 %v193_v2  ;;  %v130_v14 = vstv %s116_s2 }
  0x16   :  { %v133_v17 = vstv %s171_s25  ;;  %v144_v28 = vstv %s170_s1  ;;  %p214_p8 = por %p213_p7, %p212_p6 }
  0x17   :  { %v39_v4 = vld [vmem:[#allocation2] sm:$0xff]  ;;  %v40_v6 = vld [vmem:[#allocation2 + $0x8] sm:$0xff] }
  0x18   :  { %181 = vmatmul.mubr.msk.bf16.vlgmr.msra.gmra.mrb[0].mxu0 %vm36_vm1, %v194_v3  ;;  %p215_p9 = pnand %p214_p8, %p208_p5 }
  0xeb   :  { %v102_v5 = vpop.f32.mrb[0].mxu0 }
  0xec   :  { %v109_v7 = vadd.f32 %v102_v5, %v39_v4  ;;  %v182_v8 = vpop.f32.mrb[1].mxu0 }
  0xed   :  { %v105_v9 = vpop.f32.mrb[2].mxu0 }
  0xee   :  { %111 = vst.msk [vmem:[#allocation2] sm:$0xff] %vm36_vm1, %v109_v7  ;;  %v110_v10 = vadd.f32 %v105_v9, %v40_v6  ;;  %v183_v11 = vpop.f32.mrb[3].mxu0 }
  0xf0   :  { %112 = vst.msk [vmem:[#allocation2 + $0x8] sm:$0xff] %vm36_vm1, %v110_v10 }
  0xf5   :  { %v119_v13 = vld [vmem:[#allocation2] sm:$0xff] }
  0xf6   :  { %v128_v15 = vadd.f32 %v172_v12, %v119_v13 }
  0xf7   :  { %v120_v16 = vld [vmem:[#allocation2 + $0x8] sm:$0xff] }
  0xf8   :  { %v129_v18 = vadd.f32 %v172_v12, %v120_v16  ;;  %v131_v19 = vmul.f32 %v130_v14, %v128_v15 }
  0xfa   :  { %v132_v20 = vmul.f32 %v130_v14, %v129_v18  ;;  %v134_v21 = vadd.f32 %v133_v17, %v131_v19 }
  0xfc   :  { %v135_v22 = vadd.f32 %v133_v17, %v132_v20  ;;  %v184_v23 = vround.rtne.f32 %v134_v21 }
  0xfe   :  { %v185_v24 = vround.rtne.f32 %v135_v22  ;;  %v138_v25 = vmax.f32 %v184_v23, -128.0 }
 0x100   :  { %v139_v26 = vmax.f32 %v185_v24, -128.0  ;;  %v140_v27 = vmin.f32 %v138_v25, 127.0 }
 0x102   :  { %v141_v29 = vmin.f32 %v139_v26, 127.0  ;;  %v142_v30 = vsub.f32 %v140_v27, %v133_v17 }
 0x104   :  { %v143_v31 = vsub.f32 %v141_v29, %v133_v17  ;;  %v145_v32 = vmul.f32 %v144_v28, %v142_v30 }
 0x106   :  { %v146_v33 = vmul.f32 %v144_v28, %v143_v31  ;;  %147 = vst.msk [vmem:[#allocation6] sm:$0xff] %vm36_vm1, %v145_v32 }
 0x108   :  { %148 = vst.msk [vmem:[#allocation6 + $0x8] sm:$0xff] %vm36_vm1, %v146_v33 }
 0x109   :  { %218 = shalt.err (!%p215_p9)
}
 0x10a   :  { %s219_s6 = scalar_lea.hbm %s302_s4, 256 }
 0x10b   :  { %p220_p10 = scmp.ne.s32.totalorder %s302_s4, %s219_s6  ;;  %p223_p11 = scmp.lt.u32.totalorder %s219_s6, %s302_s4 }
 0x10d   :  { %p225_p12 = pnand %p223_p11, %p220_p10 }
 0x10f   :  { %228 = shalt.err (!%p225_p12)
}
 0x110   :  { %s237_s11 = smov 128   ;;  %s238_s12 = smov 8  }
 0x111   :  { %160 = dma.vmem_to_hbm [thread:$0]  %s155_s28, 256, %s302_s4, [#allocation4], %s237_s11, %s237_s11, %s238_s12  }
 0x112   :  { %231 = dma.done.wait [#allocation4], 256  }
 0x113   :  { %232 = vsyncadd [#allocation4], 4294967040 }
 0x114   :  { %164 = vsyncpa [#allocation4], 1 }
 0x115   :  { %165 = vsyncpa [#allocation5], 1 }

</bundles_post_ra>
